<compile_context>
chip_gen: v5e
topology: v5e:2x2
jax: 0.10.0
libtpu: 0.0.40
codegen_flags: <defaults>
</compile_context>

<pallas_src>
import functools

import numpy as np
import jax
import jax.numpy as jnp
from jax.experimental import pallas as pl
from jax.experimental.pallas import tpu as pltpu


# ----------------------------------------------------------------------------
# Fused Pallas kernel: conv matmul -> PReLU -> flatten -> FC -> PReLU
#                      -> packed heads -> masked log-softmax
# ----------------------------------------------------------------------------
def _fused_forward_kernel(pT_ref, cw_ref, cb_ref, ca_ref,
                          fw_ref, fb_ref, fa_ref, hw_ref, hb_ref,
                          o_ref, flat_ref, *, batch, cout, spatial, head_segs):
    # ---- conv as a transposed matmul: (Cout, B*OH*OW), lane-dense -----------
    z = jnp.dot(cw_ref[...], pT_ref[...], preferred_element_type=jnp.float32)
    z = z + cb_ref[...]                               # per-out-channel bias
    z = jnp.where(z >= 0.0, z, z * ca_ref[...])       # WNPReLU (per channel)

    # ---- flatten to PyTorch NCHW order: flat[b, c*S + s] = z[c, b*S + s] ----
    for b in range(batch):
        for c in range(cout):
            flat_ref[b:b + 1, c * spatial:(c + 1) * spatial] = \
                z[c:c + 1, b * spatial:(b + 1) * spatial]

    # ---- FC + WNPReLU --------------------------------------------------------
    h = jnp.dot(flat_ref[...], fw_ref[...], preferred_element_type=jnp.float32)
    h = h + fb_ref[...]
    h = jnp.where(h >= 0.0, h, h * fa_ref[...])       # (B, fc_features)

    # ---- all class heads in one matmul + per-head masked log-softmax --------
    logits = jnp.dot(h, hw_ref[...], preferred_element_type=jnp.float32)
    logits = logits + hb_ref[...]                     # (B, NHP) lane-dense
    col = jax.lax.broadcasted_iota(jnp.int32, logits.shape, 1)
    out = jnp.zeros_like(logits)
    for start, m in head_segs:                        # log_softmax(t[:, :-1], 1)
        keep = (col >= start) & (col < start + m)
        masked = jnp.where(keep, logits, -1e30)
        mx = jnp.max(masked, axis=1, keepdims=True)
        ex = jnp.where(keep, jnp.exp(masked - mx), 0.0)
        lse = jnp.log(jnp.sum(ex, axis=1, keepdims=True)) + mx
        out = jnp.where(keep, logits - lse, out)
    o_ref[...] = out


def _fused_forward(patchesT, p):
    K, M = patchesT.shape
    cout = p["conv_wT"].shape[0]
    fin, ff = p["fc_w"].shape
    nhp = p["head_w"].shape[1]
    spatial = fin // cout
    batch = M // spatial

    kern = functools.partial(
        _fused_forward_kernel, batch=batch, cout=cout, spatial=spatial,
        head_segs=p["head_segs"])

    return pl.pallas_call(
        kern,
        out_shape=jax.ShapeDtypeStruct((batch, nhp), jnp.float32),
        grid=(1,),
        in_specs=[
            pl.BlockSpec((K, M), lambda i: (0, 0)),        # patchesT
            pl.BlockSpec((cout, K), lambda i: (0, 0)),     # conv weight (T)
            pl.BlockSpec((cout, 1), lambda i: (0, 0)),     # conv bias
            pl.BlockSpec((cout, 1), lambda i: (0, 0)),     # conv PReLU slope
            pl.BlockSpec((fin, ff), lambda i: (0, 0)),     # fc weight
            pl.BlockSpec((1, ff), lambda i: (0, 0)),       # fc bias
            pl.BlockSpec((1, ff), lambda i: (0, 0)),       # fc PReLU slope
            pl.BlockSpec((ff, nhp), lambda i: (0, 0)),     # packed head weights
            pl.BlockSpec((1, nhp), lambda i: (0, 0)),      # packed head biases
        ],
        out_specs=pl.BlockSpec((batch, nhp), lambda i: (0, 0)),
        scratch_shapes=[pltpu.VMEM((batch, cout * spatial), jnp.float32)],
        # TODO(synk): at larger batch, add a leading "parallel" M-tile grid axis
        # so v7x's second TensorCore is used; at B=2 one program suffices.
        compiler_params=pltpu.CompilerParams(
            dimension_semantics=("arbitrary",)),
    )(patchesT, p["conv_wT"], p["conv_b2"], p["conv_a2"],
      p["fc_w"], p["fc_b2"], p["fc_a2"], p["head_w"], p["head_b"])


# ----------------------------------------------------------------------------
# Host glue: paddings, single-gather im2col, weight-norm parameter packing
# ----------------------------------------------------------------------------
def get_paddings(size, num_levels):
    paddings = []
    for _ in range(num_levels - 1):
        if size % 4 == 2:
            paddings.append(1)
            size = size // 2 + 1
        else:
            paddings.append(0)
            size //= 2
    if num_levels > 0:
        paddings.append(0)
        size //= 2
    return (size, paddings)


@functools.lru_cache(maxsize=None)
def _patch_gather_index(B, C, H, W, KH, KW, stride, pad):
    """Static index such that patchesT[k, m] = xp.reshape(-1)[idx[k, m]] with
    k = c*KH*KW + ky*KW + kx (PyTorch weight order), m = b*OH*OW + oh*OW + ow."""
    Hp, Wp = H + 2 * pad, W + 2 * pad
    OH = (Hp - KH) // stride + 1
    OW = (Wp - KW) // stride + 1
    c, ky, kx = (a.reshape(-1) for a in np.meshgrid(
        np.arange(C), np.arange(KH), np.arange(KW), indexing="ij"))
    b, oh, ow = (a.reshape(-1) for a in np.meshgrid(
        np.arange(B), np.arange(OH), np.arange(OW), indexing="ij"))
    yy = oh[None, :] * stride + ky[:, None]
    xx = ow[None, :] * stride + kx[:, None]
    idx = ((b[None, :] * C + c[:, None]) * Hp + yy) * Wp + xx
    return idx.astype(np.int32), OH, OW


def _wn(v, g, axes):
    """Weight normalization: w = g * v / ||v|| (norm over `axes`, per output)."""
    nrm = jnp.sqrt(jnp.sum(v * v, axis=axes, keepdims=True) + 1e-12)
    shape = [v.shape[0]] + [1] * (v.ndim - 1)
    return g.reshape(shape) * v / nrm


def init_params(key, in_size, in_channels, conv_channels, fc_features, nclass,
                nhp=128):
    top_size, paddings = get_paddings(in_size, len(conv_channels))
    c_out = conv_channels[0]
    keys = jax.random.split(key, 8 + len(nclass))

    # WNConv2d(in_channels, c_out, 6, 2, 2 + paddings[0]) + WNPReLU(c_out)
    v = jax.random.normal(keys[0], (c_out, in_channels, 6, 6), jnp.float32) * 0.1
    g = 1.0 + 0.05 * jax.random.normal(keys[1], (c_out,), jnp.float32)
    conv_w4 = _wn(v, g, axes=(1, 2, 3))                    # (Cout, Cin, 6, 6)
    conv_b = 0.05 * jax.random.normal(keys[2], (c_out,), jnp.float32)
    conv_a = 0.25 * jnp.ones((c_out,), jnp.float32)        # PReLU default slope

    # WNLinear(c_out*top*top, fc_features) + WNPReLU(fc_features)
    fc_in = c_out * top_size * top_size
    v = jax.random.normal(keys[3], (fc_features, fc_in), jnp.float32) * 0.05
    g = 1.0 + 0.05 * jax.random.normal(keys[4], (fc_features,), jnp.float32)
    fc_w = _wn(v, g, axes=(1,)).T                          # (fc_in, fc_features)
    fc_b = 0.05 * jax.random.normal(keys[5], (fc_features,), jnp.float32)
    fc_a = 0.25 * jnp.ones((fc_features,), jnp.float32)

    # per-class heads: WNLinear(fc_features, m + 1, affine=True), packed + padded
    heads_raw, head_segs = [], []
    head_w = jnp.zeros((fc_features, nhp), jnp.float32)
    head_b = jnp.zeros((1, nhp), jnp.float32)
    off = 0
    for i, m in enumerate(nclass):
        kv, kg, kb = jax.random.split(keys[6 + i], 3)
        v = jax.random.normal(kv, (m + 1, fc_features), jnp.float32) * 0.1
        g = 1.0 + 0.05 * jax.random.normal(kg, (m + 1,), jnp.float32)
        w = _wn(v, g, axes=(1,)).T                         # (fc_features, m+1)
        b = 0.05 * jax.random.normal(kb, (m + 1,), jnp.float32)
        heads_raw.append((w, b))
        head_w = head_w.at[:, off:off + m + 1].set(w)
        head_b = head_b.at[0, off:off + m + 1].set(b)
        head_segs.append((off, m))
        off += m + 1
    assert off <= nhp

    return dict(
        pad0=paddings[0],
        # raw parameters (used by the pure-JAX reference)
        conv_w4=conv_w4, conv_b=conv_b, conv_a=conv_a,
        fc_w=fc_w, fc_b=fc_b, fc_a=fc_a, heads_raw=heads_raw,
        # pre-shaped / packed parameters (used by the fused Pallas kernel)
        conv_wT=conv_w4.reshape(c_out, -1),                # (Cout, Cin*36)
        conv_b2=conv_b.reshape(c_out, 1),
        conv_a2=conv_a.reshape(c_out, 1),
        fc_b2=fc_b.reshape(1, fc_features),
        fc_a2=fc_a.reshape(1, fc_features),
        head_w=head_w, head_b=head_b,
        head_segs=tuple(head_segs),
    )


# ----------------------------------------------------------------------------
# Forward (paired=None, random_offset=False, dummy_fake=False)
# ----------------------------------------------------------------------------
def stage2_classifier_forward(x, params):
    B, C, H, W = x.shape
    pad = 2 + params["pad0"]
    idx, _, _ = _patch_gather_index(B, C, H, W, 6, 6, 2, pad)
    xp = jnp.pad(x, ((0, 0), (0, 0), (pad, pad), (pad, pad)))
    patchesT = xp.reshape(-1)[jnp.asarray(idx)]        # (Cin*36, B*OH*OW)
    out = _fused_forward(patchesT, params)             # (B, NHP) log-probs
    return [out[:, s:s + m] for s, m in params["head_segs"]]


# ----------------------------------------------------------------------------
# Pure-JAX reference (for correctness validation in __main__)
# ----------------------------------------------------------------------------
def reference_forward(x, params):
    pad = 2 + params["pad0"]
    y = jax.lax.conv_general_dilated(
        x, params["conv_w4"], window_strides=(2, 2),
        padding=[(pad, pad), (pad, pad)],
        dimension_numbers=("NCHW", "OIHW", "NCHW"))
    y = y + params["conv_b"].reshape(1, -1, 1, 1)
    y = jnp.where(y >= 0, y, y * params["conv_a"].reshape(1, -1, 1, 1))
    flat = y.reshape(x.shape[0], -1)
    h = flat @ params["fc_w"] + params["fc_b"]
    h = jnp.where(h >= 0, h, h * params["fc_a"])
    outs = []
    for w, b in params["heads_raw"]:
        t = h @ w + b
        outs.append(jax.nn.log_softmax(t[:, :-1], axis=1))
    return outs


if __name__ == "__main__":
    B, C, S = 2, 4, 16
    nclass = [5, 3]
    key = jax.random.PRNGKey(0)
    k_x, k_p = jax.random.split(key)
    x = jax.random.normal(k_x, (B, C, S, S), jnp.float32)
    params = init_params(k_p, S, C, conv_channels=[8], fc_features=32,
                         nclass=nclass)

    fwd = jax.jit(lambda inp: stage2_classifier_forward(inp, params))
    outs = jax.block_until_ready(fwd(x))

    refs = reference_forward(x, params)
    for o, r, m in zip(outs, refs, nclass):
        assert o.shape == (B, m)
        assert bool(jnp.all(jnp.isfinite(o)))
        assert bool(jnp.allclose(jnp.sum(jnp.exp(o), axis=1), 1.0, atol=1e-4))
        assert bool(jnp.allclose(o, r, atol=5e-2, rtol=0.0)), (
            f"mismatch vs reference: {float(jnp.max(jnp.abs(o - r)))}")

    print("KERNEL_OK")
</pallas_src>

<mosaic_0001>
module attributes {stable_mosaic.version = 11 : i64} {
  func.func @_fused_forward_kernel(%arg0: i32, %arg1: memref<144x128xf32, #tpu.memory_space<vmem>>, %arg2: memref<8x144xf32, #tpu.memory_space<vmem>>, %arg3: memref<8x1xf32, #tpu.memory_space<vmem>>, %arg4: memref<8x1xf32, #tpu.memory_space<vmem>>, %arg5: memref<512x32xf32, #tpu.memory_space<vmem>>, %arg6: memref<1x32xf32, #tpu.memory_space<vmem>>, %arg7: memref<1x32xf32, #tpu.memory_space<vmem>>, %arg8: memref<32x128xf32, #tpu.memory_space<vmem>>, %arg9: memref<1x128xf32, #tpu.memory_space<vmem>>, %arg10: memref<2x128xf32, #tpu.memory_space<vmem>>, %arg11: memref<2x512xf32, #tpu.memory_space<vmem>>) attributes {dimension_semantics = [#tpu.dimension_semantics<arbitrary>], iteration_bounds = array<i64: 1>, scalar_prefetch = 0 : i64, scratch_operands = 1 : i64, tpu.core_type = #tpu.core_type<tc>, window_params = [{pipeline_mode = #tpu.pipeline_mode<synchronous>, transform_indices = @transform_0, window_bounds = array<i64: 144, 128>}, {pipeline_mode = #tpu.pipeline_mode<synchronous>, transform_indices = @transform_1, window_bounds = array<i64: 8, 144>}, {pipeline_mode = #tpu.pipeline_mode<synchronous>, transform_indices = @transform_2, window_bounds = array<i64: 8, 1>}, {pipeline_mode = #tpu.pipeline_mode<synchronous>, transform_indices = @transform_3, window_bounds = array<i64: 8, 1>}, {pipeline_mode = #tpu.pipeline_mode<synchronous>, transform_indices = @transform_4, window_bounds = array<i64: 512, 32>}, {pipeline_mode = #tpu.pipeline_mode<synchronous>, transform_indices = @transform_5, window_bounds = array<i64: 1, 32>}, {pipeline_mode = #tpu.pipeline_mode<synchronous>, transform_indices = @transform_6, window_bounds = array<i64: 1, 32>}, {pipeline_mode = #tpu.pipeline_mode<synchronous>, transform_indices = @transform_7, window_bounds = array<i64: 32, 128>}, {pipeline_mode = #tpu.pipeline_mode<synchronous>, transform_indices = @transform_8, window_bounds = array<i64: 1, 128>}, {pipeline_mode = #tpu.pipeline_mode<synchronous>, transform_indices = @transform_9, window_bounds = array<i64: 2, 128>}]} {
    %c0 = arith.constant 0 : index
    %c0_0 = arith.constant 0 : index
    %0 = vector.load %arg2[%c0, %c0_0] : memref<8x144xf32, #tpu.memory_space<vmem>>, vector<8x144xf32>
    %c0_1 = arith.constant 0 : index
    %c0_2 = arith.constant 0 : index
    %1 = vector.load %arg1[%c0_1, %c0_2] : memref<144x128xf32, #tpu.memory_space<vmem>>, vector<144x128xf32>
    %cst = arith.constant dense<0.000000e+00> : vector<8x128xf32>
    %2 = tpu.matmul %0, %1, %cst {dimension_numbers = #tpu.dot_dimension_numbers<[1], [0], [0], [1], [0, 0, 1, 1], [], []>} : vector<8x144xf32>, vector<144x128xf32>, vector<8x128xf32> -> vector<8x128xf32>
    %c0_3 = arith.constant 0 : index
    %c0_4 = arith.constant 0 : index
    %3 = vector.load %arg3[%c0_3, %c0_4] : memref<8x1xf32, #tpu.memory_space<vmem>>, vector<8x1xf32>
    %4 = vector.broadcast %3 : vector<8x1xf32> to vector<8x128xf32>
    %5 = arith.addf %2, %4 : vector<8x128xf32>
    %cst_5 = arith.constant 0.000000e+00 : f32
    %6 = vector.broadcast %cst_5 : f32 to vector<8x128xf32>
    %7 = arith.cmpf oge, %5, %6 : vector<8x128xf32>
    %c0_6 = arith.constant 0 : index
    %c0_7 = arith.constant 0 : index
    %8 = vector.load %arg4[%c0_6, %c0_7] : memref<8x1xf32, #tpu.memory_space<vmem>>, vector<8x1xf32>
    %9 = vector.broadcast %8 : vector<8x1xf32> to vector<8x128xf32>
    %10 = arith.mulf %5, %9 : vector<8x128xf32>
    %11 = arith.select %7, %5, %10 : vector<8x128xi1>, vector<8x128xf32>
    %12 = vector.extract_strided_slice %11 {offsets = [0, 0], sizes = [1, 64], strides = [1, 1]} : vector<8x128xf32> to vector<1x64xf32>
    %c0_8 = arith.constant 0 : index
    %c0_9 = arith.constant 0 : index
    %13 = vector.load %arg11[%c0_8, %c0_9] : memref<2x512xf32, #tpu.memory_space<vmem>>, vector<1x64xf32>
    tpu.vector_store %arg11[%c0_8, %c0_9], %12 {strides = array<i32>} : memref<2x512xf32, #tpu.memory_space<vmem>>, vector<1x64xf32>,
    %14 = vector.extract_strided_slice %11 {offsets = [1, 0], sizes = [1, 64], strides = [1, 1]} : vector<8x128xf32> to vector<1x64xf32>
    %c0_10 = arith.constant 0 : index
    %c64 = arith.constant 64 : index
    %15 = vector.load %arg11[%c0_10, %c64] : memref<2x512xf32, #tpu.memory_space<vmem>>, vector<1x64xf32>
    tpu.vector_store %arg11[%c0_10, %c64], %14 {strides = array<i32>} : memref<2x512xf32, #tpu.memory_space<vmem>>, vector<1x64xf32>,
    %16 = vector.extract_strided_slice %11 {offsets = [2, 0], sizes = [1, 64], strides = [1, 1]} : vector<8x128xf32> to vector<1x64xf32>
    %c0_11 = arith.constant 0 : index
    %c128 = arith.constant 128 : index
    %17 = vector.load %arg11[%c0_11, %c128] : memref<2x512xf32, #tpu.memory_space<vmem>>, vector<1x64xf32>
    tpu.vector_store %arg11[%c0_11, %c128], %16 {strides = array<i32>} : memref<2x512xf32, #tpu.memory_space<vmem>>, vector<1x64xf32>,
    %18 = vector.extract_strided_slice %11 {offsets = [3, 0], sizes = [1, 64], strides = [1, 1]} : vector<8x128xf32> to vector<1x64xf32>
    %c0_12 = arith.constant 0 : index
    %c192 = arith.constant 192 : index
    %19 = vector.load %arg11[%c0_12, %c192] : memref<2x512xf32, #tpu.memory_space<vmem>>, vector<1x64xf32>
    tpu.vector_store %arg11[%c0_12, %c192], %18 {strides = array<i32>} : memref<2x512xf32, #tpu.memory_space<vmem>>, vector<1x64xf32>,
    %20 = vector.extract_strided_slice %11 {offsets = [4, 0], sizes = [1, 64], strides = [1, 1]} : vector<8x128xf32> to vector<1x64xf32>
    %c0_13 = arith.constant 0 : index
    %c256 = arith.constant 256 : index
    %21 = vector.load %arg11[%c0_13, %c256] : memref<2x512xf32, #tpu.memory_space<vmem>>, vector<1x64xf32>
    tpu.vector_store %arg11[%c0_13, %c256], %20 {strides = array<i32>} : memref<2x512xf32, #tpu.memory_space<vmem>>, vector<1x64xf32>,
    %22 = vector.extract_strided_slice %11 {offsets = [5, 0], sizes = [1, 64], strides = [1, 1]} : vector<8x128xf32> to vector<1x64xf32>
    %c0_14 = arith.constant 0 : index
    %c320 = arith.constant 320 : index
    %23 = vector.load %arg11[%c0_14, %c320] : memref<2x512xf32, #tpu.memory_space<vmem>>, vector<1x64xf32>
    tpu.vector_store %arg11[%c0_14, %c320], %22 {strides = array<i32>} : memref<2x512xf32, #tpu.memory_space<vmem>>, vector<1x64xf32>,
    %24 = vector.extract_strided_slice %11 {offsets = [6, 0], sizes = [1, 64], strides = [1, 1]} : vector<8x128xf32> to vector<1x64xf32>
    %c0_15 = arith.constant 0 : index
    %c384 = arith.constant 384 : index
    %25 = vector.load %arg11[%c0_15, %c384] : memref<2x512xf32, #tpu.memory_space<vmem>>, vector<1x64xf32>
    tpu.vector_store %arg11[%c0_15, %c384], %24 {strides = array<i32>} : memref<2x512xf32, #tpu.memory_space<vmem>>, vector<1x64xf32>,
    %26 = vector.extract_strided_slice %11 {offsets = [7, 0], sizes = [1, 64], strides = [1, 1]} : vector<8x128xf32> to vector<1x64xf32>
    %c0_16 = arith.constant 0 : index
    %c448 = arith.constant 448 : index
    %27 = vector.load %arg11[%c0_16, %c448] : memref<2x512xf32, #tpu.memory_space<vmem>>, vector<1x64xf32>
    tpu.vector_store %arg11[%c0_16, %c448], %26 {strides = array<i32>} : memref<2x512xf32, #tpu.memory_space<vmem>>, vector<1x64xf32>,
    %28 = vector.extract_strided_slice %11 {offsets = [0, 64], sizes = [1, 64], strides = [1, 1]} : vector<8x128xf32> to vector<1x64xf32>
    %c1 = arith.constant 1 : index
    %c0_17 = arith.constant 0 : index
    %29 = vector.load %arg11[%c1, %c0_17] : memref<2x512xf32, #tpu.memory_space<vmem>>, vector<1x64xf32>
    tpu.vector_store %arg11[%c1, %c0_17], %28 {strides = array<i32>} : memref<2x512xf32, #tpu.memory_space<vmem>>, vector<1x64xf32>,
    %30 = vector.extract_strided_slice %11 {offsets = [1, 64], sizes = [1, 64], strides = [1, 1]} : vector<8x128xf32> to vector<1x64xf32>
    %c1_18 = arith.constant 1 : index
    %c64_19 = arith.constant 64 : index
    %31 = vector.load %arg11[%c1_18, %c64_19] : memref<2x512xf32, #tpu.memory_space<vmem>>, vector<1x64xf32>
    tpu.vector_store %arg11[%c1_18, %c64_19], %30 {strides = array<i32>} : memref<2x512xf32, #tpu.memory_space<vmem>>, vector<1x64xf32>,
    %32 = vector.extract_strided_slice %11 {offsets = [2, 64], sizes = [1, 64], strides = [1, 1]} : vector<8x128xf32> to vector<1x64xf32>
    %c1_20 = arith.constant 1 : index
    %c128_21 = arith.constant 128 : index
    %33 = vector.load %arg11[%c1_20, %c128_21] : memref<2x512xf32, #tpu.memory_space<vmem>>, vector<1x64xf32>
    tpu.vector_store %arg11[%c1_20, %c128_21], %32 {strides = array<i32>} : memref<2x512xf32, #tpu.memory_space<vmem>>, vector<1x64xf32>,
    %34 = vector.extract_strided_slice %11 {offsets = [3, 64], sizes = [1, 64], strides = [1, 1]} : vector<8x128xf32> to vector<1x64xf32>
    %c1_22 = arith.constant 1 : index
    %c192_23 = arith.constant 192 : index
    %35 = vector.load %arg11[%c1_22, %c192_23] : memref<2x512xf32, #tpu.memory_space<vmem>>, vector<1x64xf32>
    tpu.vector_store %arg11[%c1_22, %c192_23], %34 {strides = array<i32>} : memref<2x512xf32, #tpu.memory_space<vmem>>, vector<1x64xf32>,
    %36 = vector.extract_strided_slice %11 {offsets = [4, 64], sizes = [1, 64], strides = [1, 1]} : vector<8x128xf32> to vector<1x64xf32>
    %c1_24 = arith.constant 1 : index
    %c256_25 = arith.constant 256 : index
    %37 = vector.load %arg11[%c1_24, %c256_25] : memref<2x512xf32, #tpu.memory_space<vmem>>, vector<1x64xf32>
    tpu.vector_store %arg11[%c1_24, %c256_25], %36 {strides = array<i32>} : memref<2x512xf32, #tpu.memory_space<vmem>>, vector<1x64xf32>,
    %38 = vector.extract_strided_slice %11 {offsets = [5, 64], sizes = [1, 64], strides = [1, 1]} : vector<8x128xf32> to vector<1x64xf32>
    %c1_26 = arith.constant 1 : index
    %c320_27 = arith.constant 320 : index
    %39 = vector.load %arg11[%c1_26, %c320_27] : memref<2x512xf32, #tpu.memory_space<vmem>>, vector<1x64xf32>
    tpu.vector_store %arg11[%c1_26, %c320_27], %38 {strides = array<i32>} : memref<2x512xf32, #tpu.memory_space<vmem>>, vector<1x64xf32>,
    %40 = vector.extract_strided_slice %11 {offsets = [6, 64], sizes = [1, 64], strides = [1, 1]} : vector<8x128xf32> to vector<1x64xf32>
    %c1_28 = arith.constant 1 : index
    %c384_29 = arith.constant 384 : index
    %41 = vector.load %arg11[%c1_28, %c384_29] : memref<2x512xf32, #tpu.memory_space<vmem>>, vector<1x64xf32>
    tpu.vector_store %arg11[%c1_28, %c384_29], %40 {strides = array<i32>} : memref<2x512xf32, #tpu.memory_space<vmem>>, vector<1x64xf32>,
    %42 = vector.extract_strided_slice %11 {offsets = [7, 64], sizes = [1, 64], strides = [1, 1]} : vector<8x128xf32> to vector<1x64xf32>
    %c1_30 = arith.constant 1 : index
    %c448_31 = arith.constant 448 : index
    %43 = vector.load %arg11[%c1_30, %c448_31] : memref<2x512xf32, #tpu.memory_space<vmem>>, vector<1x64xf32>
    tpu.vector_store %arg11[%c1_30, %c448_31], %42 {strides = array<i32>} : memref<2x512xf32, #tpu.memory_space<vmem>>, vector<1x64xf32>,
    %c0_32 = arith.constant 0 : index
    %c0_33 = arith.constant 0 : index
    %44 = vector.load %arg11[%c0_32, %c0_33] : memref<2x512xf32, #tpu.memory_space<vmem>>, vector<2x512xf32>
    %c0_34 = arith.constant 0 : index
    %c0_35 = arith.constant 0 : index
    %45 = vector.load %arg5[%c0_34, %c0_35] : memref<512x32xf32, #tpu.memory_space<vmem>>, vector<512x32xf32>
    %cst_36 = arith.constant dense<0.000000e+00> : vector<2x32xf32>
    %46 = tpu.matmul %44, %45, %cst_36 {dimension_numbers = #tpu.dot_dimension_numbers<[1], [0], [0], [1], [0, 0, 1, 1], [], []>} : vector<2x512xf32>, vector<512x32xf32>, vector<2x32xf32> -> vector<2x32xf32>
    %c0_37 = arith.constant 0 : index
    %c0_38 = arith.constant 0 : index
    %47 = vector.load %arg6[%c0_37, %c0_38] : memref<1x32xf32, #tpu.memory_space<vmem>>, vector<1x32xf32>
    %48 = vector.broadcast %47 : vector<1x32xf32> to vector<2x32xf32>
    %49 = arith.addf %46, %48 : vector<2x32xf32>
    %cst_39 = arith.constant 0.000000e+00 : f32
    %50 = vector.broadcast %cst_39 : f32 to vector<2x32xf32>
    %51 = arith.cmpf oge, %49, %50 : vector<2x32xf32>
    %c0_40 = arith.constant 0 : index
    %c0_41 = arith.constant 0 : index
    %52 = vector.load %arg7[%c0_40, %c0_41] : memref<1x32xf32, #tpu.memory_space<vmem>>, vector<1x32xf32>
    %53 = vector.broadcast %52 : vector<1x32xf32> to vector<2x32xf32>
    %54 = arith.mulf %49, %53 : vector<2x32xf32>
    %55 = arith.select %51, %49, %54 : vector<2x32xi1>, vector<2x32xf32>
    %c0_42 = arith.constant 0 : index
    %c0_43 = arith.constant 0 : index
    %56 = vector.load %arg8[%c0_42, %c0_43] : memref<32x128xf32, #tpu.memory_space<vmem>>, vector<32x128xf32>
    %cst_44 = arith.constant dense<0.000000e+00> : vector<2x128xf32>
    %57 = tpu.matmul %55, %56, %cst_44 {dimension_numbers = #tpu.dot_dimension_numbers<[1], [0], [0], [1], [0, 0, 1, 1], [], []>} : vector<2x32xf32>, vector<32x128xf32>, vector<2x128xf32> -> vector<2x128xf32>
    %c0_45 = arith.constant 0 : index
    %c0_46 = arith.constant 0 : index
    %58 = vector.load %arg9[%c0_45, %c0_46] : memref<1x128xf32, #tpu.memory_space<vmem>>, vector<1x128xf32>
    %59 = vector.broadcast %58 : vector<1x128xf32> to vector<2x128xf32>
    %60 = arith.addf %57, %59 : vector<2x128xf32>
    %61 = tpu.iota {dimensions = array<i32: 1>} : vector<2x128xi32>
    %cst_47 = arith.constant 0.000000e+00 : f32
    %62 = vector.broadcast %cst_47 : f32 to vector<2x128xf32>
    %c0_i32 = arith.constant 0 : i32
    %63 = vector.broadcast %c0_i32 : i32 to vector<2x128xi32>
    %64 = arith.cmpi sge, %61, %63 : vector<2x128xi32>
    %c5_i32 = arith.constant 5 : i32
    %65 = vector.broadcast %c5_i32 : i32 to vector<2x128xi32>
    %66 = arith.cmpi slt, %61, %65 : vector<2x128xi32>
    %67 = arith.andi %64, %66 : vector<2x128xi1>
    %cst_48 = arith.constant -1.000000e+30 : f32
    %68 = vector.broadcast %cst_48 : f32 to vector<2x128xf32>
    %69 = arith.select %67, %60, %68 : vector<2x128xi1>, vector<2x128xf32>
    %cst_49 = arith.constant dense<0xFF800000> : vector<2xf32>
    %70 = vector.multi_reduction <maximumf>, %69, %cst_49 [1] : vector<2x128xf32> to vector<2xf32>
    %71 = vector.shape_cast %70 : vector<2xf32> to vector<2x1xf32>
    %72 = vector.broadcast %71 : vector<2x1xf32> to vector<2x128xf32>
    %73 = arith.subf %69, %72 : vector<2x128xf32>
    %74 = math.exp %73 : vector<2x128xf32>
    %cst_50 = arith.constant 0.000000e+00 : f32
    %75 = vector.broadcast %cst_50 : f32 to vector<2x128xf32>
    %76 = arith.select %67, %74, %75 : vector<2x128xi1>, vector<2x128xf32>
    %cst_51 = arith.constant dense<0.000000e+00> : vector<2xf32>
    %77 = vector.multi_reduction <add>, %76, %cst_51 [1] : vector<2x128xf32> to vector<2xf32>
    %78 = vector.shape_cast %77 : vector<2xf32> to vector<2x1xf32>
    %79 = math.log %78 : vector<2x1xf32>
    %80 = arith.addf %79, %71 : vector<2x1xf32>
    %81 = vector.broadcast %80 : vector<2x1xf32> to vector<2x128xf32>
    %82 = arith.subf %60, %81 : vector<2x128xf32>
    %83 = arith.select %67, %82, %62 : vector<2x128xi1>, vector<2x128xf32>
    %c6_i32 = arith.constant 6 : i32
    %84 = vector.broadcast %c6_i32 : i32 to vector<2x128xi32>
    %85 = arith.cmpi sge, %61, %84 : vector<2x128xi32>
    %c9_i32 = arith.constant 9 : i32
    %86 = vector.broadcast %c9_i32 : i32 to vector<2x128xi32>
    %87 = arith.cmpi slt, %61, %86 : vector<2x128xi32>
    %88 = arith.andi %85, %87 : vector<2x128xi1>
    %cst_52 = arith.constant -1.000000e+30 : f32
    %89 = vector.broadcast %cst_52 : f32 to vector<2x128xf32>
    %90 = arith.select %88, %60, %89 : vector<2x128xi1>, vector<2x128xf32>
    %cst_53 = arith.constant dense<0xFF800000> : vector<2xf32>
    %91 = vector.multi_reduction <maximumf>, %90, %cst_53 [1] : vector<2x128xf32> to vector<2xf32>
    %92 = vector.shape_cast %91 : vector<2xf32> to vector<2x1xf32>
    %93 = vector.broadcast %92 : vector<2x1xf32> to vector<2x128xf32>
    %94 = arith.subf %90, %93 : vector<2x128xf32>
    %95 = math.exp %94 : vector<2x128xf32>
    %cst_54 = arith.constant 0.000000e+00 : f32
    %96 = vector.broadcast %cst_54 : f32 to vector<2x128xf32>
    %97 = arith.select %88, %95, %96 : vector<2x128xi1>, vector<2x128xf32>
    %cst_55 = arith.constant dense<0.000000e+00> : vector<2xf32>
    %98 = vector.multi_reduction <add>, %97, %cst_55 [1] : vector<2x128xf32> to vector<2xf32>
    %99 = vector.shape_cast %98 : vector<2xf32> to vector<2x1xf32>
    %100 = math.log %99 : vector<2x1xf32>
    %101 = arith.addf %100, %92 : vector<2x1xf32>
    %102 = vector.broadcast %101 : vector<2x1xf32> to vector<2x128xf32>
    %103 = arith.subf %60, %102 : vector<2x128xf32>
    %104 = arith.select %88, %103, %83 : vector<2x128xi1>, vector<2x128xf32>
    %c0_56 = arith.constant 0 : index
    %c0_57 = arith.constant 0 : index
    %105 = vector.load %arg10[%c0_56, %c0_57] : memref<2x128xf32, #tpu.memory_space<vmem>>, vector<2x128xf32>
    tpu.vector_store %arg10[%c0_56, %c0_57], %104 {strides = array<i32>} : memref<2x128xf32, #tpu.memory_space<vmem>>, vector<2x128xf32>,
    return
  }
  func.func @transform_0(%arg0: i32) -> (i32, i32) {
    %c0_i32 = arith.constant 0 : i32
    %c0_i32_0 = arith.constant 0 : i32
    %c0_i32_1 = arith.constant 0 : i32
    return %c0_i32, %c0_i32_0 : i32, i32
  }
  func.func @transform_1(%arg0: i32) -> (i32, i32) {
    %c0_i32 = arith.constant 0 : i32
    %c0_i32_0 = arith.constant 0 : i32
    %c0_i32_1 = arith.constant 0 : i32
    return %c0_i32, %c0_i32_0 : i32, i32
  }
  func.func @transform_2(%arg0: i32) -> (i32, i32) {
    %c0_i32 = arith.constant 0 : i32
    %c0_i32_0 = arith.constant 0 : i32
    %c0_i32_1 = arith.constant 0 : i32
    return %c0_i32, %c0_i32_0 : i32, i32
  }
  func.func @transform_3(%arg0: i32) -> (i32, i32) {
    %c0_i32 = arith.constant 0 : i32
    %c0_i32_0 = arith.constant 0 : i32
    %c0_i32_1 = arith.constant 0 : i32
    return %c0_i32, %c0_i32_0 : i32, i32
  }
  func.func @transform_4(%arg0: i32) -> (i32, i32) {
    %c0_i32 = arith.constant 0 : i32
    %c0_i32_0 = arith.constant 0 : i32
    %c0_i32_1 = arith.constant 0 : i32
    return %c0_i32, %c0_i32_0 : i32, i32
  }
  func.func @transform_5(%arg0: i32) -> (i32, i32) {
    %c0_i32 = arith.constant 0 : i32
    %c0_i32_0 = arith.constant 0 : i32
    %c0_i32_1 = arith.constant 0 : i32
    return %c0_i32, %c0_i32_0 : i32, i32
  }
  func.func @transform_6(%arg0: i32) -> (i32, i32) {
    %c0_i32 = arith.constant 0 : i32
    %c0_i32_0 = arith.constant 0 : i32
    %c0_i32_1 = arith.constant 0 : i32
    return %c0_i32, %c0_i32_0 : i32, i32
  }
  func.func @transform_7(%arg0: i32) -> (i32, i32) {
    %c0_i32 = arith.constant 0 : i32
    %c0_i32_0 = arith.constant 0 : i32
    %c0_i32_1 = arith.constant 0 : i32
    return %c0_i32, %c0_i32_0 : i32, i32
  }
  func.func @transform_8(%arg0: i32) -> (i32, i32) {
    %c0_i32 = arith.constant 0 : i32
    %c0_i32_0 = arith.constant 0 : i32
    %c0_i32_1 = arith.constant 0 : i32
    return %c0_i32, %c0_i32_0 : i32, i32
  }
  func.func @transform_9(%arg0: i32) -> (i32, i32) {
    %c0_i32 = arith.constant 0 : i32
    %c0_i32_0 = arith.constant 0 : i32
    %c0_i32_1 = arith.constant 0 : i32
    return %c0_i32, %c0_i32_0 : i32, i32
  }
}

</mosaic_0001>

<bundles_post_ra>
// kernel: _lambda_.1
= control target key start
LH: loop header
LB: loop body
LE: loop exit
PB: predicated region body
PF: predicated region fallthrough
CT: control target
= control target key end

     0   :  { %v477_v2 = vmov 0   ;;  %vm58_vm0 = vcmask 130048   ;;  %vm111_vm2 = vcmask 516096   ;;  %s478_s29 = smov 64   ;;  %vm119_vm3 = vcmask 1040896   ;;  %s858_s0 = inlined_call_operand.vmem [shape: f32[144,128], index: 0, kind: input, shape index: {}]   ;;  %s859_s2 = inlined_call_operand.vmem [shape: f32[8,1], index: 2, kind: input, shape index: {}]   ;;  %s860_s1 = inlined_call_operand.vmem [shape: f32[8,144], index: 1, kind: input, shape index: {}]   ;;  %s861_s3 = inlined_call_operand.vmem [shape: f32[8,1], index: 3, kind: input, shape index: {}]   ;;  %s862_s4 = inlined_call_operand.vmem [shape: f32[512,32], index: 4, kind: input, shape index: {}]   ;;  %s863_s5 = inlined_call_operand.vmem [shape: f32[1,32], index: 5, kind: input, shape index: {}]   ;;  %s864_s6 = inlined_call_operand.vmem [shape: f32[1,32], index: 6, kind: input, shape index: {}]   ;;  %s865_s8 = inlined_call_operand.vmem [shape: f32[1,128], index: 8, kind: input, shape index: {}]   ;;  %s866_s7 = inlined_call_operand.vmem [shape: f32[32,128], index: 7, kind: input, shape index: {}]   ;;  %s867_s9 = inlined_call_operand.vmem [shape: f32[2,128], index: 9, kind: output, shape index: {}]  }
   0x1   :  { %v49_v0 = vld [vmem:[%s858_s0 + $0x78] sm:$0xff]  ;;  %v48_v1 = vld [vmem:[%s858_s0 + $0x70] sm:$0xff]  ;;  %465 = vset.pattern.permute.xlu0 %v477_v2  ;;  %v47_v3 = vld [vmem:[%s858_s0 + $0x68] sm:$0xff]  ;;  %vm385_vm5 = vcmask 261120   ;;  %vm415_vm10 = vcmask 1041408  }
   0x2   :  { %62 = vmatpush.msra.mxu0 %v49_v0  ;;  %v46_v4 = vld [vmem:[%s858_s0 + $0x60] sm:$0xff]  ;;  %v51_v6 = vld [vmem:[%s858_s0 + $0x88] sm:$0xff]  ;;  %v45_v7 = vld [vmem:[%s858_s0 + $0x58] sm:$0xff] }
   0x3   :  { %v52_v5 = vld [vmem:[%s859_s2] sm:$0xff]  ;;  %96 = vmatpush.msra.mxu1 %v51_v6  ;;  %v33_v9 = vld [vmem:[%s860_s1 + $0x8] sm:$0xff]  ;;  %v44_v10 = vld [vmem:[%s858_s0 + $0x50] sm:$0xff] }
   0x4   :  { %63 = vmatpush.msra.mxu0 %v48_v1  ;;  %55 = vperm.xlu0 %465, %v52_v5   ;;  %v50_v8 = vld [vmem:[%s858_s0 + $0x80] sm:$0xff]  ;;  %v43_v11 = vld [vmem:[%s858_s0 + $0x48] sm:$0xff]  ;;  %v41_v14 = vld [vmem:[%s858_s0 + $0x38] sm:$0xff] }
   0x5   :  { %97 = vmatpush.msra.mxu1 %v50_v8  ;;  %v103_v12 = vld [vmem:[%s861_s3] sm:$0xff]  ;;  %v40_v15 = vld [vmem:[%s858_s0 + $0x30] sm:$0xff]  ;;  %v39_v16 = vld [vmem:[%s858_s0 + $0x28] sm:$0xff] }
   0x6   :  { %64 = vmatpush.msra.mxu0 %v47_v3  ;;  %455 = vmatmul.msk.f32.vlgmr.msra.gmra.mxu1 %vm58_vm0, %v33_v9  ;;  %v42_v13 = vld [vmem:[%s858_s0 + $0x40] sm:$0xff]  ;;  %v37_v18 = vld [vmem:[%s858_s0 + $0x18] sm:$0xff]  ;;  %v36_v19 = vld [vmem:[%s858_s0 + $0x10] sm:$0xff] }
   0x7   :  { %v38_v17 = vld [vmem:[%s858_s0 + $0x20] sm:$0xff]  ;;  %v35_v20 = vld [vmem:[%s858_s0 + $0x8] sm:$0xff]  ;;  %v227_v49 = vld [vmem:[%s862_s4 + $0x78] sm:$0xff] }
   0x8   :  { %65 = vmatpush.msra.mxu0 %v46_v4  ;;  %v34_v21 = vld [vmem:[%s858_s0] sm:$0xff]  ;;  %v243_v50 = vld [vmem:[%s862_s4 + $0xf8] sm:$0xff]  ;;  %290 = vmatpush.msra.mxu2 %v227_v49  ;;  %v226_v53 = vld [vmem:[%s862_s4 + $0x70] sm:$0xff] }
   0x9   :  { %v32_v22 = vld [vmem:[%s860_s1] sm:$0xff]  ;;  %v259_v51 = vld [vmem:[%s862_s4 + $0x178] sm:$0xff]  ;;  %310 = vmatpush.msra.mxu3 %v243_v50  ;;  %v242_v54 = vld [vmem:[%s862_s4 + $0xf0] sm:$0xff] }
   0xa   :  { %66 = vmatpush.msra.mxu0 %v45_v7  ;;  %v275_v52 = vld [vmem:[%s862_s4 + $0x1f8] sm:$0xff]  ;;  %330 = vmatpush.msrb.mxu1 %v259_v51  ;;  %v258_v55 = vld [vmem:[%s862_s4 + $0x170] sm:$0xff]  ;;  %v225_v57 = vld [vmem:[%s862_s4 + $0x68] sm:$0xff] }
   0xb   :  { %v274_v56 = vld [vmem:[%s862_s4 + $0x1f0] sm:$0xff]  ;;  %291 = vmatpush.msra.mxu2 %v226_v53  ;;  %311 = vmatpush.msra.mxu3 %v242_v54  ;;  %v241_v58 = vld [vmem:[%s862_s4 + $0xe8] sm:$0xff]  ;;  %v224_v61 = vld [vmem:[%s862_s4 + $0x60] sm:$0xff] }
   0xc   :  { %67 = vmatpush.msra.mxu0 %v44_v10  ;;  %106 = vperm.xlu0 %465, %v103_v12   ;;  %v257_v59 = vld [vmem:[%s862_s4 + $0x168] sm:$0xff]  ;;  %v240_v62 = vld [vmem:[%s862_s4 + $0xe0] sm:$0xff]  ;;  %v223_v1 = vld [vmem:[%s862_s4 + $0x58] sm:$0xff] }
   0xd   :  { %v273_v60 = vld [vmem:[%s862_s4 + $0x1e8] sm:$0xff]  ;;  %331 = vmatpush.msrb.mxu1 %v258_v55  ;;  %292 = vmatpush.msra.mxu2 %v225_v57  ;;  %v256_v63 = vld [vmem:[%s862_s4 + $0x160] sm:$0xff]  ;;  %v239_v2 = vld [vmem:[%s862_s4 + $0xd8] sm:$0xff] }
   0xe   :  { %68 = vmatpush.msra.mxu0 %v43_v11  ;;  %312 = vmatpush.msra.mxu3 %v241_v58  ;;  %v272_v0 = vld [vmem:[%s862_s4 + $0x1e0] sm:$0xff]  ;;  %v255_v3 = vld [vmem:[%s862_s4 + $0x158] sm:$0xff]  ;;  %v222_v5 = vld [vmem:[%s862_s4 + $0x50] sm:$0xff] }
   0xf   :  { %332 = vmatpush.msrb.mxu1 %v257_v59  ;;  %293 = vmatpush.msra.mxu2 %v224_v61  ;;  %v271_v4 = vld [vmem:[%s862_s4 + $0x1d8] sm:$0xff]  ;;  %v238_v6 = vld [vmem:[%s862_s4 + $0xd0] sm:$0xff]  ;;  %v221_v9 = vld [vmem:[%s862_s4 + $0x48] sm:$0xff] }
  0x10   :  { %69 = vmatpush.msra.mxu0 %v42_v13  ;;  %313 = vmatpush.msra.mxu3 %v240_v62  ;;  %v254_v7 = vld [vmem:[%s862_s4 + $0x150] sm:$0xff]  ;;  %v237_v10 = vld [vmem:[%s862_s4 + $0xc8] sm:$0xff]  ;;  %v220_v13 = vld [vmem:[%s862_s4 + $0x40] sm:$0xff] }
  0x11   :  { %333 = vmatpush.msrb.mxu1 %v256_v63  ;;  %294 = vmatpush.msra.mxu2 %v223_v1  ;;  %v270_v8 = vld [vmem:[%s862_s4 + $0x1d0] sm:$0xff]  ;;  %v253_v11 = vld [vmem:[%s862_s4 + $0x148] sm:$0xff]  ;;  %v212_v49 = vld [vmem:[%s862_s4] sm:$0xff] }
  0x12   :  { %70 = vmatpush.msra.mxu0 %v41_v14  ;;  %314 = vmatpush.msra.mxu3 %v239_v2  ;;  %v269_v12 = vld [vmem:[%s862_s4 + $0x1c8] sm:$0xff]  ;;  %v236_v14 = vld [vmem:[%s862_s4 + $0xc0] sm:$0xff]  ;;  %v379_v1 = vld [vmem:[%s866_s7 + $0x10] sm:$0xff] }
  0x13   :  { %334 = vmatpush.msrb.mxu1 %v255_v3  ;;  %295 = vmatpush.msra.mxu2 %v222_v5  ;;  %v228_v50 = vld [vmem:[%s862_s4 + $0x80] sm:$0xff]  ;;  %v378_v2 = vld [vmem:[%s866_s7 + $0x8] sm:$0xff] }
  0x14   :  { %71 = vmatpush.msra.mxu0 %v40_v15  ;;  %315 = vmatpush.msra.mxu3 %v238_v6  ;;  %v252_v15 = vld [vmem:[%s862_s4 + $0x140] sm:$0xff] }
  0x15   :  { %335 = vmatpush.msrb.mxu1 %v254_v7  ;;  %296 = vmatpush.msra.mxu2 %v221_v9  ;;  %v244_v53 = vld [vmem:[%s862_s4 + $0x100] sm:$0xff] }
  0x16   :  { %72 = vmatpush.msra.mxu0 %v39_v16  ;;  %316 = vmatpush.msra.mxu3 %v237_v10  ;;  %v268_v16 = vld [vmem:[%s862_s4 + $0x1c0] sm:$0xff] }
  0x17   :  { %336 = vmatpush.msrb.mxu1 %v253_v11  ;;  %297 = vmatpush.msra.mxu2 %v220_v13  ;;  %v260_v54 = vld [vmem:[%s862_s4 + $0x180] sm:$0xff] }
  0x18   :  { %73 = vmatpush.msra.mxu0 %v38_v17  ;;  %v219_v17 = vld [vmem:[%s862_s4 + $0x38] sm:$0xff]  ;;  %317 = vmatpush.msra.mxu3 %v236_v14  ;;  %v377_v3 = vld [vmem:[%s866_s7] sm:$0xff] }
  0x19   :  { %337 = vmatpush.msrb.mxu1 %v252_v15  ;;  %298 = vmatpush.msra.mxu2 %v219_v17  ;;  %v467_v11 = vld [vmem:[%s864_s6] ss:$0 sm:$0xff] }
  0x1a   :  { %74 = vmatpush.msra.mxu0 %v37_v18  ;;  %v235_v18 = vld [vmem:[%s862_s4 + $0xb8] sm:$0xff] }
  0x1b   :  { %318 = vmatpush.msra.mxu3 %v235_v18  ;;  %v468_v18 = vld [vmem:[%s865_s8] ss:$0 sm:$0xff] }
  0x1c   :  { %75 = vmatpush.msra.mxu0 %v36_v19  ;;  %v251_v19 = vld [vmem:[%s862_s4 + $0x138] sm:$0xff] }
  0x1d   :  { %338 = vmatpush.msrb.mxu1 %v251_v19 }
  0x1e   :  { %76 = vmatpush.msra.mxu0 %v35_v20  ;;  %v267_v20 = vld [vmem:[%s862_s4 + $0x1b8] sm:$0xff] }
  0x20   :  { %77 = vmatpush.msra.mxu0 %v34_v21  ;;  %v218_v21 = vld [vmem:[%s862_s4 + $0x30] sm:$0xff] }
  0x21   :  { %78 = vmatmul.f32.vlgmr.msra.gmra.mxu0 %v32_v22  ;;  %v234_v22 = vld [vmem:[%s862_s4 + $0xb0] sm:$0xff]  ;;  %299 = vmatpush.msra.mxu2 %v218_v21 }
  0x22   :  { %350 = vmatpush.msrb.mxu0 %v275_v52  ;;  %319 = vmatpush.msra.mxu3 %v234_v22 }
  0x24   :  { %351 = vmatpush.msrb.mxu0 %v274_v56 }
  0x26   :  { %352 = vmatpush.msrb.mxu0 %v273_v60 }
  0x28   :  { %353 = vmatpush.msrb.mxu0 %v272_v0  ;;  %v380_v0 = vld [vmem:[%s866_s7 + $0x18] sm:$0xff] }
  0x2a   :  { %354 = vmatpush.msrb.mxu0 %v271_v4  ;;  %v466_v4 = vld [vmem:[%s863_s5] ss:$0 sm:$0xff] }
  0x2c   :  { %355 = vmatpush.msrb.mxu0 %v270_v8 }
  0x2e   :  { %356 = vmatpush.msrb.mxu0 %v269_v12 }
  0x30   :  { %357 = vmatpush.msrb.mxu0 %v268_v16  ;;  %v409_v16 = vlaneseq }
  0x32   :  { %358 = vmatpush.msrb.mxu0 %v267_v20  ;;  %v410_v17 = vand.u32 127, %v409_v16 }
  0x34   :  { %vm431_vm6 = vcmp.ge.s32.totalorder %v410_v17, 6  ;;  %vm432_vm7 = vcmp.lt.s32.totalorder %v410_v17, 9  ;;  %vm412_vm9 = vcmp.lt.s32.totalorder %v410_v17, 5 }
  0x35   :  { %vm838_vm8 = vmand %vm431_vm6, %vm432_vm7 }
  0x76   :  { %v56_v23 = vpop.permute.xlu0 %55 }
  0x7e   :  { %v107_v28 = vpop.permute.xlu0 %106 }
  0x83   :  { %v99_v25 = vpop.f32.mrf.mxu1 }
  0x9e   :  { %v79_v24 = vpop.f32.mrf.mxu0 }
  0x9f   :  { %v80_v26 = vadd.f32 %v79_v24, %v56_v23  ;;  %v250_v23 = vld [vmem:[%s862_s4 + $0x130] sm:$0xff] }
  0xa0   :  { %v266_v24 = vld [vmem:[%s862_s4 + $0x1b0] sm:$0xff]  ;;  %339 = vmatpush.msrb.mxu1 %v250_v23 }
  0xa1   :  { %v100_v27 = vadd.f32 %v99_v25, %v80_v26  ;;  %v217_v25 = vld [vmem:[%s862_s4 + $0x28] sm:$0xff]  ;;  %359 = vmatpush.msrb.mxu0 %v266_v24 }
  0xa2   :  { %v233_v26 = vld [vmem:[%s862_s4 + $0xa8] sm:$0xff]  ;;  %300 = vmatpush.msra.mxu2 %v217_v25 }
  0xa3   :  { %vm102_vm1 = vcmp.ge.f32.partialorder %v100_v27, 0.0  ;;  %v109_v29 = vmul.f32 %v107_v28, %v100_v27  ;;  %v265_v28 = vld [vmem:[%s862_s4 + $0x1a8] sm:$0xff]  ;;  %320 = vmatpush.msra.mxu3 %v233_v26 }
  0xa4   :  { %360 = vmatpush.msrb.mxu0 %v265_v28 }
  0xa5   :  { %v110_v30 = vsel %vm102_vm1, %v100_v27, %v109_v29  ;;  %v249_v27 = vld [vmem:[%s862_s4 + $0x128] sm:$0xff]  ;;  %v216_v29 = vld [vmem:[%s862_s4 + $0x20] sm:$0xff] }
  0xa6   :  { %121 = vst.sshfl [vmem:[#allocation1] sm:$0xff pattern:$0x73625140] %v110_v30  ;;  %163 = vrot.lane.b32.xlu1 %v110_v30, %s478_s29  ;;  %v114_v31 = vrot.slane %v110_v30, 7  ;;  %340 = vmatpush.msrb.mxu1 %v249_v27 }
  0xa7   :  { %112 = vst.msk [vmem:[#allocation2] sm:$0x1] %vm111_vm2, %v110_v30  ;;  %301 = vmatpush.msra.mxu2 %v216_v29 }
  0xa8   :  { %v115_v32 = vrot.slane %v114_v31, 2 }
  0xaa   :  { %116 = vrot.lane.b32.xlu0 %v115_v32, %s478_s29 }
  0xad   :  { %v123_v33 = vld [vmem:[#allocation1 + $0x1] ss:$4 sm:$0xff] }
  0xae   :  { %126 = vst.sshfl [vmem:[#allocation1] sm:$0xff pattern:$0x73625140] %v110_v30 }
  0xaf   :  { %125 = vst.msk [vmem:[#allocation2 + $0x2] sm:$0x1] %vm111_vm2, %v123_v33  ;;  %v248_v33 = vld [vmem:[%s862_s4 + $0x120] sm:$0xff] }
  0xb0   :  { %341 = vmatpush.msrb.mxu1 %v248_v33 }
  0xb5   :  { %v128_v34 = vld [vmem:[#allocation1 + $0x1] ss:$4 sm:$0xff] }
  0xb6   :  { %135 = vst.sshfl [vmem:[#allocation1] sm:$0xff pattern:$0x73625140] %v110_v30  ;;  %v456_v41 = vrot.slane %v128_v34, 9  ;;  %v264_v34 = vld [vmem:[%s862_s4 + $0x1a0] sm:$0xff] }
  0xb7   :  { %361 = vmatpush.msrb.mxu0 %v264_v34 }
  0xbd   :  { %v137_v35 = vld [vmem:[#allocation1 + $0x2] ss:$4 sm:$0xff] }
  0xbe   :  { %140 = vst.sshfl [vmem:[#allocation1] sm:$0xff pattern:$0x73625140] %v110_v30 }
  0xbf   :  { %139 = vst.msk [vmem:[#allocation2 + $0x4] sm:$0x1] %vm111_vm2, %v137_v35  ;;  %v215_v35 = vld [vmem:[%s862_s4 + $0x18] sm:$0xff] }
  0xc0   :  { %302 = vmatpush.msra.mxu2 %v215_v35 }
  0xc5   :  { %v142_v36 = vld [vmem:[#allocation1 + $0x2] ss:$4 sm:$0xff] }
  0xc6   :  { %149 = vst.sshfl [vmem:[#allocation1] sm:$0xff pattern:$0x73625140] %v110_v30  ;;  %v457_v46 = vrot.slane %v142_v36, 9  ;;  %v231_v36 = vld [vmem:[%s862_s4 + $0x98] sm:$0xff] }
  0xcd   :  { %v151_v37 = vld [vmem:[#allocation1 + $0x3] ss:$4 sm:$0xff] }
  0xce   :  { %154 = vst.sshfl [vmem:[#allocation1] sm:$0xff pattern:$0x73625140] %v110_v30 }
  0xcf   :  { %153 = vst.msk [vmem:[#allocation2 + $0x6] sm:$0x1] %vm111_vm2, %v151_v37 }
  0xd5   :  { %v156_v38 = vld [vmem:[#allocation1 + $0x3] ss:$4 sm:$0xff] }
  0xd6   :  { %v458_v39 = vrot.slane %v156_v38, 9  ;;  %169 = vst.sshfl [vmem:[#allocation1] sm:$0xff pattern:$0x73625140] %v110_v30  ;;  %v247_v38 = vld [vmem:[%s862_s4 + $0x118] sm:$0xff] }
  0xd7   :  { %342 = vmatpush.msrb.mxu1 %v247_v38 }
  0xd8   :  { %159 = vrot.lane.b32.xlu0 %v458_v39, %s478_s29  ;;  %v263_v39 = vld [vmem:[%s862_s4 + $0x198] sm:$0xff] }
  0xd9   :  { %362 = vmatpush.msrb.mxu0 %v263_v39 }
  0xdd   :  { %v171_v40 = vld [vmem:[#allocation1 + $0x1] ss:$4 sm:$0xff] }
  0xde   :  { %172 = vrot.lane.b32.xlu1 %v171_v40, %s478_s29  ;;  %176 = vst.sshfl [vmem:[#allocation1] sm:$0xff pattern:$0x73625140] %v110_v30  ;;  %v214_v40 = vld [vmem:[%s862_s4 + $0x10] sm:$0xff] }
  0xdf   :  { %303 = vmatpush.msra.mxu2 %v214_v40 }
  0xe5   :  { %v603_v42 = vld [vmem:[#allocation1 + $0x1] ss:$4 sm:$0xff] }
  0xe6   :  { %183 = vst.sshfl [vmem:[#allocation1] sm:$0xff pattern:$0x73625140] %v110_v30  ;;  %131 = vrot.lane.b32.xlu1 %v456_v41, %s478_s29  ;;  %v230_v41 = vld [vmem:[%s862_s4 + $0x90] sm:$0xff]  ;;  %v459_v52 = vrot.slane %v603_v42, 9 }
  0xed   :  { %v185_v43 = vld [vmem:[#allocation1 + $0x2] ss:$4 sm:$0xff] }
  0xee   :  { %186 = vrot.lane.b32.xlu2 %v185_v43, %s478_s29  ;;  %190 = vst.sshfl [vmem:[#allocation1] sm:$0xff pattern:$0x73625140] %v110_v30  ;;  %v246_v43 = vld [vmem:[%s862_s4 + $0x110] sm:$0xff] }
  0xef   :  { %343 = vmatpush.msrb.mxu1 %v246_v43 }
  0xf5   :  { %v607_v44 = vld [vmem:[#allocation1 + $0x2] ss:$4 sm:$0xff] }
  0xf6   :  { %197 = vst.sshfl [vmem:[#allocation1] sm:$0xff pattern:$0x73625140] %v110_v30 }
  0xfd   :  { %v199_v45 = vld [vmem:[#allocation1 + $0x3] ss:$4 sm:$0xff] }
  0xfe   :  { %200 = vrot.lane.b32.xlu2 %v199_v45, %s478_s29  ;;  %204 = vst.sshfl [vmem:[#allocation1] sm:$0xff pattern:$0x73625140] %v110_v30  ;;  %v232_v30 = vld [vmem:[%s862_s4 + $0xa0] sm:$0xff]  ;;  %v213_v45 = vld [vmem:[%s862_s4 + $0x8] sm:$0xff] }
  0xff   :  { %321 = vmatpush.msra.mxu3 %v232_v30  ;;  %304 = vmatpush.msra.mxu2 %v213_v45 }
 0x101   :  { %322 = vmatpush.msra.mxu3 %v231_v36  ;;  %305 = vmatpush.msra.mxu2 %v212_v49 }
 0x103   :  { %323 = vmatpush.msra.mxu3 %v230_v41  ;;  %401 = vmatpush.msrb.mxu2 %v380_v0 }
 0x105   :  { %v206_v42 = vld [vmem:[#allocation1 + $0x3] ss:$4 sm:$0xff]  ;;  %402 = vmatpush.msrb.mxu2 %v379_v1 }
 0x106   :  { %145 = vrot.lane.b32.xlu2 %v457_v46, %s478_s29  ;;  %v229_v46 = vld [vmem:[%s862_s4 + $0x88] sm:$0xff]  ;;  %v461_v56 = vrot.slane %v206_v42, 9 }
 0x107   :  { %324 = vmatpush.msra.mxu3 %v229_v46  ;;  %403 = vmatpush.msrb.mxu2 %v378_v2 }
 0x109   :  { %325 = vmatpush.msra.mxu3 %v228_v50  ;;  %404 = vmatpush.msrb.mxu2 %v377_v3 }
 0x118   :  { %v164_v47 = vpop.permute.xlu1 %163 }
 0x119   :  { %166 = vst.msk [vmem:[#allocation2 + $0x1] sm:$0x1] %vm111_vm2, %v164_v47  ;;  %v245_v47 = vld [vmem:[%s862_s4 + $0x108] sm:$0xff] }
 0x11a   :  { %168 = vst.msk [vmem:[#allocation2 + $0x1] sm:$0x1] %vm119_vm3, %v115_v32  ;;  %v460_v32 = vrot.slane %v607_v44, 9  ;;  %v262_v44 = vld [vmem:[%s862_s4 + $0x190] sm:$0xff]  ;;  %344 = vmatpush.msrb.mxu1 %v245_v47 }
 0x11b   :  { %363 = vmatpush.msrb.mxu0 %v262_v44 }
 0x11c   :  { %v117_v48 = vpop.permute.xlu0 %116  ;;  %345 = vmatpush.msrb.mxu1 %v244_v53 }
 0x11d   :  { %120 = vst.msk [vmem:[#allocation2] sm:$0x1] %vm119_vm3, %v117_v48  ;;  %v261_v48 = vld [vmem:[%s862_s4 + $0x188] sm:$0xff] }
 0x11e   :  { %364 = vmatpush.msrb.mxu0 %v261_v48 }
 0x120   :  { %365 = vmatpush.msrb.mxu0 %v260_v54 }
 0x148   :  { %v187_v31 = vpop.permute.xlu2 %186 }
 0x149   :  { %189 = vst.msk [vmem:[#allocation2 + $0x5] sm:$0x1] %vm111_vm2, %v187_v31 }
 0x14a   :  { %196 = vst.msk [vmem:[#allocation2 + $0x5] sm:$0x1] %vm119_vm3, %v460_v32  ;;  %v160_v37 = vpop.permute.xlu0 %159 }
 0x14b   :  { %162 = vst.msk [vmem:[#allocation2 + $0x6] sm:$0x1] %vm119_vm3, %v160_v37 }
 0x150   :  { %v173_v51 = vpop.permute.xlu1 %172 }
 0x151   :  { %175 = vst.msk [vmem:[#allocation2 + $0x3] sm:$0x1] %vm111_vm2, %v173_v51 }
 0x152   :  { %182 = vst.msk [vmem:[#allocation2 + $0x3] sm:$0x1] %vm119_vm3, %v459_v52 }
 0x158   :  { %v201_v55 = vpop.permute.xlu2 %200  ;;  %v132_v57 = vpop.permute.xlu1 %131 }
 0x159   :  { %203 = vst.msk [vmem:[#allocation2 + $0x7] sm:$0x1] %vm111_vm2, %v201_v55 }
 0x15a   :  { %210 = vst.msk [vmem:[#allocation2 + $0x7] sm:$0x1] %vm119_vm3, %v461_v56 }
 0x15b   :  { %134 = vst.msk [vmem:[#allocation2 + $0x2] sm:$0x1] %vm119_vm3, %v132_v57 }
 0x160   :  { %v146_v58 = vpop.permute.xlu2 %145 }
 0x161   :  { %148 = vst.msk [vmem:[#allocation2 + $0x4] sm:$0x1] %vm119_vm3, %v146_v58 }
 0x168   :  { %v211_v59 = vld [vmem:[#allocation2] sm:$0xff] }
 0x169   :  { %281 = vst [vmem:[#allocation1] ss:$4 sm:$0xff] %v211_v59 }
 0x170   :  { %v282_v60 = vld.sshfl [vmem:[#allocation1] sm:$0xff pattern:$0x73625140]  ;;  %v283_v61 = vld.sshfl [vmem:[#allocation1 + $0x8] sm:$0xff pattern:$0x73625140] }
 0x171   :  { %306 = vmatmul.f32.vlgmr.msra.gmra.mxu2 %v282_v60  ;;  %326 = vmatmul.f32.vlgmr.msra.gmra.mxu3 %v283_v61  ;;  %v284_v62 = vld.sshfl [vmem:[#allocation1 + $0x10] sm:$0xff pattern:$0x73625140]  ;;  %v285_v63 = vld.sshfl [vmem:[#allocation1 + $0x18] sm:$0xff pattern:$0x73625140] }
 0x172   :  { %346 = vmatmul.f32.vlgmr.msrb.gmra.mxu1 %v284_v62  ;;  %366 = vmatmul.f32.vlgmr.msrb.gmra.mxu0 %v285_v63 }
 0x1ef   :  { %v347_v9 = vpop.f32.mrf.mxu1  ;;  %v367_v12 = vpop.f32.mrf.mxu0 }
 0x1f4   :  { %v307_v5 = vpop.f32.mrf.mxu2  ;;  %v327_v7 = vpop.f32.mrf.mxu3 }
 0x1f5   :  { %v308_v6 = vadd.f32 %v466_v4, %v307_v5 }
 0x1f7   :  { %v328_v8 = vadd.f32 %v327_v7, %v308_v6 }
 0x1f9   :  { %v348_v10 = vadd.f32 %v347_v9, %v328_v8 }
 0x1fb   :  { %v368_v13 = vadd.f32 %v367_v12, %v348_v10 }
 0x1fd   :  { %vm370_vm4 = vcmp.ge.f32.partialorder %v368_v13, 0.0  ;;  %v375_v14 = vmul.f32 %v467_v11, %v368_v13 }
 0x1ff   :  { %v376_v15 = vsel %vm370_vm4, %v368_v13, %v375_v14 }
 0x200   :  { %462 = vmatmul.msk.f32.vlgmr.msrb.gmra.mxu2 %vm385_vm5, %v376_v15 }
 0x283   :  { %v406_v19 = vpop.f32.mrf.mxu2 }
 0x284   :  { %v407_v21 = vadd.f32 %v468_v18, %v406_v19 }
 0x286   :  { %v434_v22 = vsel %vm838_vm8, %v407_v21, -1e+30  ;;  %v414_v23 = vsel %vm412_vm9, %v407_v21, -1e+30 }
 0x287   :  { %v435_v24 = vsel %vm415_vm10, %v434_v22, -inf  ;;  %v416_v25 = vsel %vm415_vm10, %v414_v23, -inf }
 0x288   :  { %436 = vmax.xlane.f32.xlu2 %v435_v24  ;;  %417 = vmax.xlane.f32.xlu1 %v416_v25 }
 0x2fb   :  { %v437_v26 = vpop.xlane.xlu2 %436  ;;  %v418_v27 = vpop.xlane.xlu1 %417 }
 0x2fc   :  { %v438_v28 = vsub.f32 %v434_v22, %v437_v26  ;;  %v419_v29 = vsub.f32 %v414_v23, %v418_v27 }
 0x2fe   :  { %v439_v30 = vmul.f32 1.442695, %v438_v28  ;;  %v420_v31 = vmul.f32 1.442695, %v419_v29 }
 0x300   :  { %469 = vpow2.f32 %v439_v30 }
 0x301   :  { %471 = vpow2.f32 %v420_v31 }
 0x306   :  { %v470_v32 = vpop.eup %469 }
 0x307   :  { %v472_v33 = vpop.eup %471  ;;  %v441_v34 = vsel %vm838_vm8, %v470_v32, 0.0 }
 0x308   :  { %v442_v35 = vsel %vm415_vm10, %v441_v34, 0.0  ;;  %v422_v36 = vsel %vm412_vm9, %v472_v33, 0.0 }
 0x309   :  { %443 = vadd.xlane.f32.xlu2 %v442_v35  ;;  %v423_v37 = vsel %vm415_vm10, %v422_v36, 0.0 }
 0x30a   :  { %424 = vadd.xlane.f32.xlu0 %v423_v37 }
 0x37c   :  { %v444_v38 = vpop.xlane.xlu2 %443 }
 0x37d   :  { %473 = vlog2.f32 %v444_v38  ;;  %v425_v39 = vpop.xlane.xlu0 %424 }
 0x37e   :  { %475 = vlog2.f32 %v425_v39 }
 0x383   :  { %v474_v40 = vpop.eup %473 }
 0x384   :  { %v476_v41 = vpop.eup %475  ;;  %v446_v43 = vmul.f32 0.6931472, %v474_v40 }
 0x385   :  { %v427_v44 = vmul.f32 0.6931472, %v476_v41 }
 0x386   :  { %v447_v45 = vadd.f32 %v446_v43, %v437_v26 }
 0x387   :  { %v428_v46 = vadd.f32 %v427_v44, %v418_v27 }
 0x388   :  { %v448_v47 = vsub.f32 %v407_v21, %v447_v45 }
 0x389   :  { %v429_v48 = vsub.f32 %v407_v21, %v428_v46 }
 0x38b   :  { %v430_v49 = vsel %vm412_vm9, %v429_v48, 0.0 }
 0x38c   :  { %v449_v50 = vsel %vm838_vm8, %v448_v47, %v430_v49 }
 0x38d   :  { %450 = vst [vmem:[%s867_s9] sm:$0x3] %v449_v50 }

</bundles_post_ra>
